<compile_context>
chip_gen: v6e
topology: v6e:2x2x1
jax: 0.10.0
libtpu: 0.0.40
codegen_flags: <defaults>
</compile_context>

<pallas_src>
import functools

import jax
import jax.numpy as jnp
from jax.experimental import pallas as pl
from jax.experimental.pallas import tpu as pltpu


def _round_up(v, m):
    return ((v + m - 1) // m) * m


def _tpu_generation():
    """Best-effort TPU generation from device_kind (0 if unknown)."""
    try:
        kind = jax.devices()[0].device_kind.lower()
    except Exception:
        return 0
    for g in (7, 6, 5, 4, 3, 2):
        if str(g) in kind:
            return g
    return 0


def _use_bf16_tanh():
    # v6e / v7x have a bf16 EUP path (~2x tanh throughput); v5e/older keep f32.
    return _tpu_generation() >= 6


def _vmem_capacity_bytes():
    try:
        return int(pltpu.get_tpu_info().vmem_capacity_bytes)
    except Exception:
        # Conservative fallback (v7x per-TensorCore VMEM); safe everywhere.
        return 64 * 1024 * 1024


def _choose_batch_tile(bz, vmem_cap, bytes_per_row, resident_bytes):
    """Largest TB that fits ~40% of VMEM; >=2 grid steps when bz >= 16 so both
    v7x TensorCores get work and DMA/compute overlap on every generation."""
    budget = int(0.4 * vmem_cap) - resident_bytes
    tb_cap = max(8, (max(budget, 0) // max(bytes_per_row, 1)) // 8 * 8)
    if bz <= 8 or (bz < 16 and tb_cap >= bz):
        return bz                                      # single full-array block
    if bz >= 16:
        tb_cap = min(tb_cap, _round_up(pl.cdiv(bz, 2), 8))   # >= 2 grid steps
    return min(tb_cap, _round_up(bz, 8))


def tanh_ngram_kernel(x_ref, m_ref, w_ref, b_ref, lout_ref, out_ref, *,
                      kz_max, bf16_tanh):
    TB, L, F = x_ref.shape
    C = lout_ref.shape[1]                              # n_kernels * out_feat

    # masked_tensor(x, m): x streams as bf16; upcast to f32 only for the mask mul.
    m_f = m_ref[...].astype(jnp.float32)               # [TB, L]  (exact 0/1)
    m3 = m_f[:, :, None]                               # hoisted broadcast
    xm = x_ref[...].astype(jnp.float32) * m3           # [TB, L, F] f32

    # Tap-fold: x_cat[:, t, j*F:(j+1)*F] = xm[:, (t+j) mod L, :].  The circular
    # wrap only touches rows t >= L - kz + 1, which are masked out of both
    # poolings below.  (Equivalent single-XLU-op form: pltpu.roll(xm, L-j, 1).)
    parts = [xm]
    for j in range(1, kz_max):
        parts.append(jnp.roll(xm, -j, axis=1))
    x_cat = jnp.concatenate(parts, axis=2).astype(jnp.bfloat16)   # [TB, L, kz_max*F]

    # ONE wide bf16 MXU matmul with the taps folded into the contraction
    # (K = kz_max*F, output columns = n_k*out_feat), f32 accumulation.
    z = jax.lax.dot_general(
        x_cat, w_ref[...],
        dimension_numbers=(((2,), (0,)), ((), ())),
        preferred_element_type=jnp.float32)             # [TB, L, C] f32

    zb = z + b_ref[...]                                  # per-column bias
    if bf16_tanh:                                        # v6e/v7x: bf16 EUP tanh
        y = jnp.tanh(zb.astype(jnp.bfloat16)).astype(jnp.float32)
    else:                                                # v5e: f32 EUP only
        y = jnp.tanh(zb)

    # Per-column conv-output validity: position t is valid iff t < L - kz + 1.
    t_idx = jax.lax.broadcasted_iota(jnp.int32, (L, C), 0)
    valid_b = t_idx < lout_ref[...]                      # bool [L, C]
    valid_f = valid_b.astype(jnp.float32)

    # MAX pool over all conv-output positions (F.max_pool1d semantics: the
    # sequence mask is NOT applied here, matching the reference module).
    maxes = jnp.max(jnp.where(valid_b[None], y, -jnp.inf), axis=1)   # [TB, C]

    # Masked AVG pool (MaskedAvgPooling1d with the mask truncated to lout).
    w_avg = m3 * valid_f[None]                           # [TB, L, C]
    num = jnp.sum(y * w_avg, axis=1)                     # [TB, C]
    denom = jnp.sum(w_avg, axis=1) + 1e-8
    avgs = num * pl.reciprocal(denom, approx=True)       # EUP slot, ~free

    res = jnp.concatenate([maxes, avgs], axis=1)         # [TB, 2C]
    pad = out_ref.shape[1] - 2 * C
    if pad > 0:                                          # keep the store lane-dense
        res = jnp.concatenate([res, jnp.zeros((TB, pad), res.dtype)], axis=1)
    out_ref[...] = res                                   # single unmasked vst


def tanh_ngram_feat(x, mask, weights, biases, kernel_sizes, out_feat):
    """TanhNgramFeat forward, mode='MAX_AVG'. Returns [bz, 2*n_k*out_feat] f32."""
    bz, L, F = x.shape
    n_k = len(kernel_sizes)
    kz_max = max(kernel_sizes)
    C = n_k * out_feat
    total = 2 * C
    out_pad = _round_up(total, 128)                      # lane-dense output store

    # --- parameter packing (once, outside the kernel) ---------------------------
    # W_all[j*F:(j+1)*F, k*O:(k+1)*O] = W_k[j]; zero rows for taps j >= kz_k.
    Kfold = kz_max * F
    w_all = jnp.zeros((Kfold, C), jnp.float32)
    for k, (w, kz) in enumerate(zip(weights, kernel_sizes)):
        for j in range(kz):
            w_all = w_all.at[j * F:(j + 1) * F,
                             k * out_feat:(k + 1) * out_feat].set(w[j])
    w_all = w_all.astype(jnp.bfloat16)
    b_all = jnp.concatenate([b.reshape(1, out_feat) for b in biases],
                            axis=1).astype(jnp.float32)
    lout_cols = jnp.concatenate(
        [jnp.full((1, out_feat), L - kz + 1, jnp.int32) for kz in kernel_sizes],
        axis=1)                                          # [1, C] int32

    # --- stream activations in bf16 (halves x/mask HBM traffic and VMEM) --------
    x_bf = x.astype(jnp.bfloat16)
    m_bf = mask.astype(jnp.bfloat16)

    # --- generation-aware batch tile & VMEM budget -------------------------------
    vmem_cap = _vmem_capacity_bytes()
    Fp = _round_up(F, 128)                               # lane padding of in_feat
    Kp = _round_up(Kfold, 128)
    Cp = _round_up(C, 128)
    bytes_per_row = (
        2 * L * Fp * 2                                   # x block (bf16, 2 buffers)
        + 2 * _round_up(L, 128) * 2                      # mask block (bf16, 2 buffers)
        + L * Fp * 4 * (kz_max + 1)                      # f32 xm + shifted copies
        + L * Kp * (4 + 2)                               # x_cat (f32 concat + bf16)
        + 4 * L * Cp * 4                                 # z / y / pooling temps (f32)
        + 2 * _round_up(out_pad, 128) * 4)               # output block (f32, 2 buffers)
    resident_bytes = 2 * (Kp * Cp * 2) + 4 * 8 * Cp * 4  # packed W / bias / lout
    TB = _choose_batch_tile(bz, vmem_cap, bytes_per_row, resident_bytes)
    grid = (pl.cdiv(bz, TB),)
    vmem_limit = int(min(vmem_cap, 128 * 1024 * 1024) * 0.8)   # ~20% headroom

    kernel = functools.partial(tanh_ngram_kernel, kz_max=kz_max,
                               bf16_tanh=_use_bf16_tanh())

    out = pl.pallas_call(
        kernel,
        grid=grid,
        in_specs=[
            pl.BlockSpec((TB, L, F), lambda i: (i, 0, 0)),     # x (bf16)
            pl.BlockSpec((TB, L), lambda i: (i, 0)),           # mask (bf16)
            pl.BlockSpec(w_all.shape, lambda i: (0, 0)),       # resident packed W
            pl.BlockSpec(b_all.shape, lambda i: (0, 0)),       # resident biases
            pl.BlockSpec(lout_cols.shape, lambda i: (0, 0)),   # resident per-col lout
        ],
        out_specs=pl.BlockSpec((TB, out_pad), lambda i: (i, 0)),
        out_shape=jax.ShapeDtypeStruct((bz, out_pad), jnp.float32),
        compiler_params=pltpu.CompilerParams(
            dimension_semantics=("parallel",),
            vmem_limit_bytes=vmem_limit),
    )(x_bf, m_bf, w_all, b_all, lout_cols)

    return out[:, :total] if out_pad != total else out


def ref_forward(x, mask, weights, biases, kernel_sizes, out_feat,
                matmul_dtype=jnp.float32, tanh_dtype=jnp.float32):
    """Pure-JAX reference mirroring the PyTorch forward (mode='MAX_AVG')."""
    mask_f = mask.astype(jnp.float32)
    xm = (x * mask_f[:, :, None]).astype(matmul_dtype)
    maxes, avgs = [], []
    for w, b, kz in zip(weights, biases, kernel_sizes):
        lout = x.shape[1] - kz + 1
        wc = w.astype(matmul_dtype)
        acc = jnp.zeros((x.shape[0], lout, out_feat), jnp.float32)
        for j in range(kz):
            acc = acc + jnp.einsum('blf,fo->blo', xm[:, j:j + lout, :], wc[j],
                                   preferred_element_type=jnp.float32)
        y = jnp.tanh((acc + b).astype(tanh_dtype)).astype(jnp.float32)
        maxes.append(jnp.max(y, axis=1))
        m_t = mask_f[:, :lout]
        avgs.append(jnp.sum(y * m_t[:, :, None], axis=1)
                    / (jnp.sum(m_t, axis=1, keepdims=True) + 1e-8))
    return jnp.concatenate(maxes + avgs, axis=1)


if __name__ == "__main__":
    # Small shapes consistent with the module's forward.
    bz, seq_len, in_feat = 2, 16, 32
    out_feat = 32
    kernel_sizes = (2, 3)

    key = jax.random.PRNGKey(0)
    keys = jax.random.split(key, 2 + 2 * len(kernel_sizes))

    x = jax.random.normal(keys[0], (bz, seq_len, in_feat), jnp.float32)
    lengths = jnp.array([seq_len, seq_len - 5])
    mask = jnp.arange(seq_len)[None, :] < lengths[:, None]      # [bz, seq_len] bool

    # Synthetic Conv1d parameters (torch [O, I, kz] pre-transposed per tap -> [kz, I, O]).
    weights, biases = [], []
    for i, kz in enumerate(kernel_sizes):
        w = 0.1 * jax.random.normal(keys[2 + 2 * i], (kz, in_feat, out_feat), jnp.float32)
        b = 0.1 * jax.random.normal(keys[3 + 2 * i], (1, out_feat), jnp.float32)
        weights.append(w)
        biases.append(b)

    out = tanh_ngram_feat(x, mask, weights, biases, kernel_sizes, out_feat)
    out = jax.block_until_ready(out)
    assert out.shape == (bz, 2 * len(kernel_sizes) * out_feat)

    # Tight check: reference with the same bf16 matmul operands (f32 accumulation)
    # and the same tanh precision the kernel selected for this TPU generation.
    bf16_tanh = _use_bf16_tanh()
    tanh_dt = jnp.bfloat16 if bf16_tanh else jnp.float32
    ref_tight = ref_forward(x, mask, weights, biases, kernel_sizes, out_feat,
                            matmul_dtype=jnp.bfloat16, tanh_dtype=tanh_dt)
    tol = 6e-3 if bf16_tanh else 2e-3       # allow one-ULP bf16 tanh rounding flips
    assert jnp.allclose(out, ref_tight, atol=tol, rtol=tol), (
        f"max abs err vs matched ref {jnp.max(jnp.abs(out - ref_tight))}")

    # Loose sanity check vs full-f32 math (bf16 operand rounding dominates).
    ref_f32 = ref_forward(x, mask, weights, biases, kernel_sizes, out_feat)
    assert jnp.allclose(out, ref_f32, atol=3e-2, rtol=3e-2), (
        f"max abs err vs f32 ref {jnp.max(jnp.abs(out - ref_f32))}")

    print("KERNEL_OK")
</pallas_src>

<mosaic_0001>
module attributes {stable_mosaic.version = 11 : i64} {
  func.func @tanh_ngram_kernel(%arg0: i32, %arg1: memref<2x16x32xbf16, #tpu.memory_space<vmem>>, %arg2: memref<2x16xbf16, #tpu.memory_space<vmem>>, %arg3: memref<96x64xbf16, #tpu.memory_space<vmem>>, %arg4: memref<1x64xf32, #tpu.memory_space<vmem>>, %arg5: memref<1x64xi32, #tpu.memory_space<vmem>>, %arg6: memref<2x128xf32, #tpu.memory_space<vmem>>) attributes {dimension_semantics = [#tpu.dimension_semantics<parallel>], iteration_bounds = array<i64: 1>, scalar_prefetch = 0 : i64, scratch_operands = 0 : i64, tpu.core_type = #tpu.core_type<tc>, window_params = [{transform_indices = @transform_0, window_bounds = array<i64: 2, 16, 32>}, {transform_indices = @transform_1, window_bounds = array<i64: 2, 16>}, {pipeline_mode = #tpu.pipeline_mode<synchronous>, transform_indices = @transform_2, window_bounds = array<i64: 96, 64>}, {pipeline_mode = #tpu.pipeline_mode<synchronous>, transform_indices = @transform_3, window_bounds = array<i64: 1, 64>}, {pipeline_mode = #tpu.pipeline_mode<synchronous>, transform_indices = @transform_4, window_bounds = array<i64: 1, 64>}, {transform_indices = @transform_5, window_bounds = array<i64: 2, 128>}]} {
    %c0 = arith.constant 0 : index
    %c0_0 = arith.constant 0 : index
    %0 = vector.load %arg2[%c0, %c0_0] : memref<2x16xbf16, #tpu.memory_space<vmem>>, vector<2x16xbf16>
    %1 = arith.extf %0 : vector<2x16xbf16> to vector<2x16xf32>
    %2 = vector.shape_cast %1 : vector<2x16xf32> to vector<2x16x1xf32>
    %c0_1 = arith.constant 0 : index
    %c0_2 = arith.constant 0 : index
    %c0_3 = arith.constant 0 : index
    %3 = vector.load %arg1[%c0_1, %c0_2, %c0_3] : memref<2x16x32xbf16, #tpu.memory_space<vmem>>, vector<2x16x32xbf16>
    %4 = arith.extf %3 : vector<2x16x32xbf16> to vector<2x16x32xf32>
    %5 = vector.broadcast %2 : vector<2x16x1xf32> to vector<2x16x32xf32>
    %6 = arith.mulf %4, %5 : vector<2x16x32xf32>
    %7 = vector.extract_strided_slice %6 {offsets = [0, 1, 0], sizes = [2, 15, 32], strides = [1, 1, 1]} : vector<2x16x32xf32> to vector<2x15x32xf32>
    %8 = vector.extract_strided_slice %6 {offsets = [0, 0, 0], sizes = [2, 1, 32], strides = [1, 1, 1]} : vector<2x16x32xf32> to vector<2x1x32xf32>
    %9 = tpu.concatenate %7, %8 in 1 : vector<2x15x32xf32>, vector<2x1x32xf32> -> vector<2x16x32xf32>
    %10 = vector.extract_strided_slice %6 {offsets = [0, 2, 0], sizes = [2, 14, 32], strides = [1, 1, 1]} : vector<2x16x32xf32> to vector<2x14x32xf32>
    %11 = vector.extract_strided_slice %6 {offsets = [0, 0, 0], sizes = [2, 2, 32], strides = [1, 1, 1]} : vector<2x16x32xf32> to vector<2x2x32xf32>
    %12 = tpu.concatenate %10, %11 in 1 : vector<2x14x32xf32>, vector<2x2x32xf32> -> vector<2x16x32xf32>
    %13 = tpu.concatenate %6, %9, %12 in 2 : vector<2x16x32xf32>, vector<2x16x32xf32>, vector<2x16x32xf32> -> vector<2x16x96xf32>
    %14 = arith.truncf %13 : vector<2x16x96xf32> to vector<2x16x96xbf16>
    %c0_4 = arith.constant 0 : index
    %c0_5 = arith.constant 0 : index
    %15 = vector.load %arg3[%c0_4, %c0_5] : memref<96x64xbf16, #tpu.memory_space<vmem>>, vector<96x64xbf16>
    %cst = arith.constant dense<0.000000e+00> : vector<2x16x64xf32>
    %16 = tpu.matmul %14, %15, %cst {dimension_numbers = #tpu.dot_dimension_numbers<[2], [0], [0, 1], [1], [0, 0, 0, 1, 1, 1], [], []>} : vector<2x16x96xbf16>, vector<96x64xbf16>, vector<2x16x64xf32> -> vector<2x16x64xf32>
    %c0_6 = arith.constant 0 : index
    %c0_7 = arith.constant 0 : index
    %17 = vector.load %arg4[%c0_6, %c0_7] : memref<1x64xf32, #tpu.memory_space<vmem>>, vector<1x64xf32>
    %18 = vector.shape_cast %17 : vector<1x64xf32> to vector<1x1x64xf32>
    %19 = vector.broadcast %18 : vector<1x1x64xf32> to vector<2x16x64xf32>
    %20 = arith.addf %16, %19 : vector<2x16x64xf32>
    %21 = math.tanh %20 : vector<2x16x64xf32>
    %22 = tpu.iota {dimensions = array<i32: 0>} : vector<16x64xi32>
    %c0_8 = arith.constant 0 : index
    %c0_9 = arith.constant 0 : index
    %23 = vector.load %arg5[%c0_8, %c0_9] : memref<1x64xi32, #tpu.memory_space<vmem>>, vector<1x64xi32>
    %24 = vector.broadcast %23 : vector<1x64xi32> to vector<16x64xi32>
    %25 = arith.cmpi slt, %22, %24 : vector<16x64xi32>
    %26 = arith.extui %25 : vector<16x64xi1> to vector<16x64xi32>
    %27 = arith.sitofp %26 : vector<16x64xi32> to vector<16x64xf32>
    %28 = vector.shape_cast %25 : vector<16x64xi1> to vector<1x16x64xi1>
    %cst_10 = arith.constant 0xFF800000 : f32
    %29 = vector.shape_cast %28 : vector<1x16x64xi1> to vector<1x16x64xi1>
    %30 = vector.broadcast %29 : vector<1x16x64xi1> to vector<2x16x64xi1>
    %31 = vector.broadcast %cst_10 : f32 to vector<2x16x64xf32>
    %32 = arith.select %30, %21, %31 : vector<2x16x64xi1>, vector<2x16x64xf32>
    %cst_11 = arith.constant dense<0xFF800000> : vector<2x64xf32>
    %33 = vector.multi_reduction <maximumf>, %32, %cst_11 [1] : vector<2x16x64xf32> to vector<2x64xf32>
    %34 = vector.shape_cast %27 : vector<16x64xf32> to vector<1x16x64xf32>
    %35 = vector.broadcast %2 : vector<2x16x1xf32> to vector<2x16x64xf32>
    %36 = vector.broadcast %34 : vector<1x16x64xf32> to vector<2x16x64xf32>
    %37 = arith.mulf %35, %36 : vector<2x16x64xf32>
    %38 = arith.mulf %21, %37 : vector<2x16x64xf32>
    %cst_12 = arith.constant dense<0.000000e+00> : vector<2x64xf32>
    %39 = vector.multi_reduction <add>, %38, %cst_12 [1] : vector<2x16x64xf32> to vector<2x64xf32>
    %cst_13 = arith.constant dense<0.000000e+00> : vector<2x64xf32>
    %40 = vector.multi_reduction <add>, %37, %cst_13 [1] : vector<2x16x64xf32> to vector<2x64xf32>
    %cst_14 = arith.constant 9.99999993E-9 : f32
    %41 = vector.broadcast %cst_14 : f32 to vector<2x64xf32>
    %42 = arith.addf %40, %41 : vector<2x64xf32>
    %43 = tpu.reciprocal %42 {approx = true} : vector<2x64xf32> -> vector<2x64xf32>
    %44 = arith.mulf %39, %43 : vector<2x64xf32>
    %45 = tpu.concatenate %33, %44 in 1 : vector<2x64xf32>, vector<2x64xf32> -> vector<2x128xf32>
    %c0_15 = arith.constant 0 : index
    %c0_16 = arith.constant 0 : index
    %46 = vector.load %arg6[%c0_15, %c0_16] : memref<2x128xf32, #tpu.memory_space<vmem>>, vector<2x128xf32>
    tpu.vector_store %arg6[%c0_15, %c0_16], %45 {strides = array<i32>} : memref<2x128xf32, #tpu.memory_space<vmem>>, vector<2x128xf32>,
    return
  }
  func.func @transform_0(%arg0: i32) -> (i32, i32, i32) {
    %c0_i32 = arith.constant 0 : i32
    %c0_i32_0 = arith.constant 0 : i32
    %c0_i32_1 = arith.constant 0 : i32
    return %arg0, %c0_i32, %c0_i32_0 : i32, i32, i32
  }
  func.func @transform_1(%arg0: i32) -> (i32, i32) {
    %c0_i32 = arith.constant 0 : i32
    %c0_i32_0 = arith.constant 0 : i32
    return %arg0, %c0_i32 : i32, i32
  }
  func.func @transform_2(%arg0: i32) -> (i32, i32) {
    %c0_i32 = arith.constant 0 : i32
    %c0_i32_0 = arith.constant 0 : i32
    %c0_i32_1 = arith.constant 0 : i32
    return %c0_i32, %c0_i32_0 : i32, i32
  }
  func.func @transform_3(%arg0: i32) -> (i32, i32) {
    %c0_i32 = arith.constant 0 : i32
    %c0_i32_0 = arith.constant 0 : i32
    %c0_i32_1 = arith.constant 0 : i32
    return %c0_i32, %c0_i32_0 : i32, i32
  }
  func.func @transform_4(%arg0: i32) -> (i32, i32) {
    %c0_i32 = arith.constant 0 : i32
    %c0_i32_0 = arith.constant 0 : i32
    %c0_i32_1 = arith.constant 0 : i32
    return %c0_i32, %c0_i32_0 : i32, i32
  }
  func.func @transform_5(%arg0: i32) -> (i32, i32) {
    %c0_i32 = arith.constant 0 : i32
    %c0_i32_0 = arith.constant 0 : i32
    return %arg0, %c0_i32 : i32, i32
  }
}

</mosaic_0001>

<bundles_post_ra>
// kernel: tpu_custom_call.1
= control target key start
LH: loop header
LB: loop body
LE: loop exit
PB: predicated region body
PF: predicated region fallthrough
CT: control target
= control target key end

     0   :  { %v24_v1 = vlaneseq  ;;  %s596_s0 = inlined_call_operand.vmem [shape: bf16[2,16,32], index: 0, kind: input, shape index: {}]   ;;  %s597_s1 = inlined_call_operand.vmem [shape: bf16[2,16], index: 1, kind: input, shape index: {}]   ;;  %s598_s2 = inlined_call_operand.vmem [shape: bf16[96,64], index: 2, kind: input, shape index: {}]   ;;  %s599_s3 = inlined_call_operand.vmem [shape: f32[1,64], index: 3, kind: input, shape index: {}]   ;;  %s600_s4 = inlined_call_operand.vmem [shape: s32[1,64], index: 4, kind: input, shape index: {}]   ;;  %s601_s5 = inlined_call_operand.hbm [shape: f32[2,128], index: 5, kind: output, shape index: {}]  }
   0x1   :  { %v22_v0 = vld [vmem:[%s597_s1] sm:$0x1] }
   0x2   :  { %v23_v2 = vunpack.c.l.bf16 %v22_v0  ;;  %v504_v3 = vshrl.u32 %v24_v1, 7 }
   0x4   :  { %v37_v4 = vsub.s32 1, %v504_v3  ;;  %v26_v5 = vsub.s32 0, %v504_v3 }
   0x6   :  { %v38_v6 = vrot.slane %v23_v2, %v37_v4  ;;  %v27_v7 = vrot.slane %v23_v2, %v26_v5 }
   0x7   :  { %10 = vsyncpa [#allocation3], 0  ;;  %v427_v8 = vld [vmem:[%s598_s2 + $0x28] sm:$0xff]   ;;  %v428_v9 = vld [vmem:[%s598_s2 + $0x20] sm:$0xff]   ;;  %vm62_vm0 = vcmask 1046528   ;;  %vm75_vm1 = vcmask 1045504  }
   0x8   :  { %40 = vbcast.lane.b32.xlu1 %v38_v6, 256  ;;  %29 = vbcast.lane.b32.xlu0 %v27_v7, 256  ;;  %v429_v10 = vld [vmem:[%s598_s2 + $0x18] sm:$0xff]   ;;  %v430_v11 = vld [vmem:[%s598_s2 + $0x10] sm:$0xff]   ;;  %v378_v12 = vld [vmem:[%s596_s0 + $0x8] sm:$0xff]   ;;  %s468_s9 = smov 64  }
   0x9   :  { %387 = vmatprep.subr.bf16.mxu0 %v427_v8  ;;  %v371_v13 = vld [vmem:[%s596_s0] sm:$0xff]   ;;  %v376_v14 = vunpack.c.l.bf16 %v378_v12  ;;  %v377_v18 = vunpack.c.h.bf16 %v378_v12  ;;  %v431_v20 = vld [vmem:[%s598_s2 + $0x8] sm:$0xff]   ;;  %vm116_vm2 = vcmask 261120   ;;  %vm121_vm3 = vcmask 523264  }
   0xa   :  { %388 = vmatpush3.bf16.msra.mxu0 %v427_v8  ;;  %v372_v15 = vunpack.c.l.bf16 %v371_v13  ;;  %v373_v19 = vunpack.c.h.bf16 %v371_v13  ;;  %v432_v28 = vld [vmem:[%s598_s2] sm:$0xff]   ;;  %s467_s2 = smov 32   ;;  %vm183_vm4 = vcmask 785408   ;;  %vm333_vm7 = vcmask 1041409  }
   0xb   :  { %389 = vmatprep.subr.bf16.mxu0 %v428_v9  ;;  %v367_v8 = vld [vmem:[%s600_s4] ss:$0 sm:$0xff] }
   0xc   :  { %44 = vbcast.lane.b32.xlu1 %v38_v6, 264  ;;  %33 = vbcast.lane.b32.xlu0 %v27_v7, 264  ;;  %v245_v7 = vadd.s32 8, %v504_v3  ;;  %vm251_vm6 = vcmp.lt.s32.totalorder %v504_v3, %v367_v8 }
   0xe   :  { %390 = vmatpush3.bf16.msra.mxu0 %v428_v9  ;;  %vm252_vm5 = vcmp.lt.s32.totalorder %v245_v7, %v367_v8  ;;  %v469_v9 = vmov 0.0  }
   0xf   :  { %391 = vmatprep.subr.bf16.mxu0 %v429_v10 }
  0x12   :  { %392 = vmatpush3.bf16.msra.mxu0 %v429_v10  ;;  %v369_v10 = vsel %vm252_vm5, 1.0, %v469_v9 }
  0x13   :  { %393 = vmatprep.subr.bf16.mxu0 %v430_v11 }
  0x16   :  { %394 = vmatpush3.bf16.msra.mxu0 %v430_v11  ;;  %v368_v11 = vsel %vm251_vm6, 1.0, %v469_v9 }
  0x17   :  { %395 = vmatprep.subr.bf16.mxu0 %v431_v20 }
  0x1a   :  { %396 = vmatpush3.bf16.msra.mxu0 %v431_v20 }
  0x1b   :  { %397 = vmatprep.subr.bf16.mxu0 %v432_v28 }
  0x1e   :  { %398 = vmatpush3.bf16.msra.mxu0 %v432_v28 }
  0x7a   :  { %v526_v16 = vpop.permute.xlu1 %40  ;;  %v528_v17 = vpop.permute.xlu0 %29 }
  0x7b   :  { %v56_v21 = vmul.f32 %v376_v14, %v526_v16  ;;  %v54_v22 = vmul.f32 %v372_v15, %v528_v17  ;;  %v283_v13 = vmul.f32 %v368_v11, %v526_v16  ;;  %v281_v15 = vmul.f32 %v368_v11, %v528_v17  ;;  %v358_v16 = vld [vmem:[%s599_s3] ss:$0 sm:$0xff]  ;;  %s470_s3 = smov [#allocation2]  }
  0x7c   :  { %s350_s13 = sshll.u32 %s470_s3, 4  ;;  %s351_s13 = int_to_ptr.vmem [resolvable:$true] %s350_s13 }
  0x7d   :  { %v66_v27 = vrot.slane %v56_v21, 1  ;;  %v63_v29 = vrot.slane %v54_v22, 1  ;;  %v79_v34 = vrot.slane %v56_v21, 2  ;;  %v76_v38 = vrot.slane %v54_v22, 2  ;;  %s445_s14 = scalar_lea.vmem %s351_s13, 32  ;;  %p450_p1 = scmp.lt.s32.totalorder %s351_s13, %s351_s13 }
  0x7e   :  { %v535_v23 = vpop.permute.xlu1 %44  ;;  %v537_v24 = vpop.permute.xlu0 %33  ;;  %p446_p0 = scmp.ne.s32.totalorder %s351_s13, %s445_s14  ;;  %p451_p2 = scmp.lt.s32.totalorder %s445_s14, %s445_s14 }
  0x7f   :  { %v57_v25 = vmul.f32 %v377_v18, %v535_v23  ;;  %v55_v26 = vmul.f32 %v373_v19, %v537_v24  ;;  %v284_v12 = vmul.f32 %v369_v10, %v535_v23  ;;  %v282_v14 = vmul.f32 %v369_v10, %v537_v24 }
  0x80   :  { %v316_v19 = vsel %vm121_vm3, %v283_v13, 0.0  ;;  %p452_p3 = por %p451_p2, %p450_p1 }
  0x81   :  { %v67_v30 = vrot.slane %v57_v25, 1  ;;  %v80_v31 = vrot.slane %v57_v25, 2  ;;  %v64_v32 = vrot.slane %v55_v26, 1  ;;  %v77_v33 = vrot.slane %v55_v26, 2 }
  0x82   :  { %v317_v18 = vsel %vm121_vm3, %v284_v12, 0.0  ;;  %v308_v20 = vsel %vm121_vm3, %v282_v14, 0.0  ;;  %p453_p4 = pnand %p452_p3, %p446_p0 }
  0x83   :  { %v68_v35 = vsel %vm62_vm0, %v66_v27, %v67_v30  ;;  %v74_v36 = vsel %vm62_vm0, %v67_v30, %v66_v27  ;;  %v65_v37 = vsel %vm62_vm0, %v63_v29, %v64_v32  ;;  %v73_v40 = vsel %vm62_vm0, %v64_v32, %v63_v29 }
  0x84   :  { %v412_v39 = vpack.i.bf16 %v74_v36, %v68_v35  ;;  %v407_v41 = vpack.i.bf16 %v73_v40, %v65_v37  ;;  %v81_v42 = vsel %vm75_vm1, %v79_v34, %v80_v31  ;;  %v87_v43 = vsel %vm75_vm1, %v80_v31, %v79_v34 }
  0x85   :  { %v78_v44 = vsel %vm75_vm1, %v76_v38, %v77_v33  ;;  %v86_v45 = vsel %vm75_vm1, %v77_v33, %v76_v38  ;;  %v422_v46 = vpack.i.bf16 %v87_v43, %v81_v42 }
  0x86   :  { %413 = vrot.lane.b32.xlu1 %v412_v39, %s467_s2  ;;  %408 = vrot.lane.b32.xlu0 %v407_v41, %s467_s2  ;;  %v417_v47 = vpack.i.bf16 %v86_v45, %v78_v44 }
  0x8a   :  { %423 = vrot.lane.b32.xlu1 %v422_v46, %s468_s9  ;;  %418 = vrot.lane.b32.xlu0 %v417_v47, %s468_s9 }
  0xf8   :  { %v414_v48 = vpop.permute.xlu1 %413  ;;  %v409_v49 = vpop.permute.xlu0 %408 }
  0xf9   :  { %v416_v50 = vunpack.i.h.bf16 %v414_v48  ;;  %v415_v51 = vunpack.i.l.bf16 %v414_v48  ;;  %v411_v52 = vunpack.i.h.bf16 %v409_v49  ;;  %v410_v53 = vunpack.i.l.bf16 %v409_v49 }
  0xfb   :  { %v120_v58 = vsel %vm116_vm2, %v57_v25, %v416_v50  ;;  %v119_v59 = vsel %vm116_vm2, %v56_v21, %v415_v51  ;;  %v117_v0 = vsel %vm116_vm2, %v54_v22, %v410_v53  ;;  %v118_v1 = vsel %vm116_vm2, %v55_v26, %v411_v52 }
  0xfc   :  { %v424_v54 = vpop.permute.xlu1 %423  ;;  %v419_v57 = vpop.permute.xlu0 %418  ;;  %v318_v21 = vadd.f32 %v317_v18, %v316_v19  ;;  %v307_v22 = vsel %vm121_vm3, %v281_v15, 0.0 }
  0xfd   :  { %v426_v55 = vunpack.i.h.bf16 %v424_v54  ;;  %v425_v56 = vunpack.i.l.bf16 %v424_v54  ;;  %v421_v60 = vunpack.i.h.bf16 %v419_v57  ;;  %v420_v61 = vunpack.i.l.bf16 %v419_v57 }
  0xfe   :  { %v309_v25 = vadd.f32 %v308_v20, %v307_v22  ;;  %v319_v26 = vrot.slane %v318_v21, 4 }
  0xff   :  { %v124_v62 = vsel %vm121_vm3, %v119_v59, %v425_v56  ;;  %v125_v63 = vsel %vm121_vm3, %v120_v58, %v426_v55  ;;  %v122_v4 = vsel %vm121_vm3, %v117_v0, %v420_v61  ;;  %v123_v5 = vsel %vm121_vm3, %v118_v1, %v421_v60 }
 0x100   :  { %v127_v2 = vpack.c.bf16 %v125_v63, %v124_v62  ;;  %v126_v6 = vpack.c.bf16 %v123_v5, %v122_v4  ;;  %v310_v27 = vrot.slane %v309_v25, 4  ;;  %v320_v23 = vadd.f32 %v319_v26, %v318_v21 }
 0x102   :  { %399 = vmatprep.mubr.msk.bf16.mxu0 %vm183_vm4, %v126_v6  ;;  %v311_v17 = vadd.f32 %v310_v27, %v309_v25  ;;  %v321_v31 = vrot.slane %v320_v23, 2 }
 0x103   :  { %400 = vmatmul.mubr.msk.bf16.vlgmr.msra.gmra.mxu0 %vm183_vm4, %v127_v2 }
 0x104   :  { %v312_v34 = vrot.slane %v311_v17, 2  ;;  %v322_v37 = vadd.f32 %v321_v31, %v320_v23 }
 0x106   :  { %v313_v38 = vadd.f32 %v312_v34, %v311_v17  ;;  %v323_v39 = vrot.slane %v322_v37, 1 }
 0x108   :  { %v314_v40 = vrot.slane %v313_v38, 1  ;;  %v324_v42 = vadd.f32 %v323_v39, %v322_v37 }
 0x10a   :  { %v315_v44 = vadd.f32 %v314_v40, %v313_v38  ;;  %v326_v48 = vadd.f32 1e-08, %v324_v42 }
 0x10c   :  { %v325_v54 = vadd.f32 1e-08, %v315_v44 }
 0x1c3   :  { %v401_v24 = vpop.f32.mrf.mxu0 }
 0x1c4   :  { %v233_v28 = vadd.f32 %v401_v24, %v358_v16 }
 0x1c5   :  { %v224_v29 = vpop.f32.mrf.mxu0 }
 0x1c6   :  { %433 = vtanh.f32 %v233_v28  ;;  %v225_v30 = vadd.f32 %v358_v16, %v224_v29 }
 0x1c7   :  { %v402_v32 = vpop.f32.mrf.mxu0 }
 0x1c8   :  { %435 = vtanh.f32 %v225_v30  ;;  %v236_v33 = vadd.f32 %v402_v32, %v358_v16 }
 0x1c9   :  { %v227_v35 = vpop.f32.mrf.mxu0 }
 0x1ca   :  { %437 = vtanh.f32 %v236_v33  ;;  %v228_v36 = vadd.f32 %v358_v16, %v227_v35 }
 0x1cc   :  { %439 = vtanh.f32 %v228_v36 }
 0x1cd   :  { %441 = vrcp.f32 %v326_v48 }
 0x1ce   :  { %443 = vrcp.f32 %v325_v54 }
 0x1d3   :  { %v434_v41 = vpop.eup %433 }
 0x1d4   :  { %v287_v45 = vmul.f32 %v434_v41, %v283_v13  ;;  %v261_v46 = vsel %vm251_vm6, %v434_v41, -inf }
 0x1d5   :  { %v436_v43 = vpop.eup %435  ;;  %v272_v56 = vsel %vm121_vm3, %v261_v46, -inf }
 0x1d6   :  { %v259_v49 = vsel %vm251_vm6, %v436_v43, -inf  ;;  %v285_v50 = vmul.f32 %v436_v43, %v281_v15  ;;  %v298_v55 = vsel %vm121_vm3, %v287_v45, 0.0 }
 0x1d7   :  { %v438_v47 = vpop.eup %437  ;;  %v263_v63 = vsel %vm121_vm3, %v259_v49, -inf }
 0x1d8   :  { %v262_v51 = vsel %vm252_vm5, %v438_v47, -inf  ;;  %v288_v52 = vmul.f32 %v438_v47, %v284_v12  ;;  %v289_v0 = vsel %vm121_vm3, %v285_v50, 0.0 }
 0x1d9   :  { %v440_v53 = vpop.eup %439  ;;  %v273_v57 = vsel %vm121_vm3, %v262_v51, -inf }
 0x1da   :  { %v260_v58 = vsel %vm252_vm5, %v440_v53, -inf  ;;  %v286_v59 = vmul.f32 %v440_v53, %v282_v14  ;;  %v299_v60 = vsel %vm121_vm3, %v288_v52, 0.0  ;;  %v274_v61 = vmax.f32 %v272_v56, %v273_v57  ;;  %v442_v24 = vpop.eup %441 }
 0x1db   :  { %v300_v3 = vadd.f32 %v299_v60, %v298_v55  ;;  %v264_v62 = vsel %vm121_vm3, %v260_v58, -inf  ;;  %v444_v30 = vpop.eup %443 }
 0x1dc   :  { %v290_v1 = vsel %vm121_vm3, %v286_v59, 0.0  ;;  %v275_v2 = vrot.slane %v274_v61, 4  ;;  %v265_v4 = vmax.f32 %v263_v63, %v264_v62 }
 0x1dd   :  { %v291_v5 = vadd.f32 %v290_v1, %v289_v0  ;;  %v301_v6 = vrot.slane %v300_v3, 4 }
 0x1de   :  { %v276_v7 = vmax.f32 %v274_v61, %v275_v2  ;;  %v266_v8 = vrot.slane %v265_v4, 4 }
 0x1df   :  { %v292_v9 = vrot.slane %v291_v5, 4  ;;  %v302_v10 = vadd.f32 %v301_v6, %v300_v3 }
 0x1e0   :  { %v277_v11 = vrot.slane %v276_v7, 2  ;;  %v267_v12 = vmax.f32 %v265_v4, %v266_v8 }
 0x1e1   :  { %v293_v13 = vadd.f32 %v292_v9, %v291_v5  ;;  %v303_v14 = vrot.slane %v302_v10, 2 }
 0x1e2   :  { %v278_v15 = vmax.f32 %v276_v7, %v277_v11  ;;  %v268_v18 = vrot.slane %v267_v12, 2 }
 0x1e3   :  { %v294_v19 = vrot.slane %v293_v13, 2  ;;  %v304_v20 = vadd.f32 %v303_v14, %v302_v10 }
 0x1e4   :  { %v279_v21 = vrot.slane %v278_v15, 1  ;;  %v269_v22 = vmax.f32 %v267_v12, %v268_v18 }
 0x1e5   :  { %v295_v25 = vadd.f32 %v294_v19, %v293_v13  ;;  %v305_v26 = vrot.slane %v304_v20, 1 }
 0x1e6   :  { %v270_v27 = vrot.slane %v269_v22, 1  ;;  %v280_v28 = vmax.f32 %v278_v15, %v279_v21 }
 0x1e7   :  { %v296_v16 = vrot.slane %v295_v25, 1  ;;  %v306_v23 = vadd.f32 %v305_v26, %v304_v20 }
 0x1e8   :  { %v271_v17 = vmax.f32 %v269_v22, %v270_v27 }
 0x1e9   :  { %v297_v29 = vadd.f32 %v296_v16, %v295_v25  ;;  %v330_v33 = vmul.f32 %v442_v24, %v306_v23 }
 0x1ea   :  { %v334_v31 = vsel %vm333_vm7, %v280_v28, %v271_v17 }
 0x1eb   :  { %v329_v32 = vmul.f32 %v444_v30, %v297_v29 }
 0x1ed   :  { %v338_v34 = vsel %vm333_vm7, %v330_v33, %v329_v32 }
 0x1ee   :  { %339 = vrot.lane.b32.xlu0 %v338_v34, %s468_s9 }
 0x260   :  { %v340_v35 = vpop.permute.xlu0 %339 }
 0x261   :  { %v342_v36 = vsel %vm121_vm3, %v334_v31, %v340_v35 }
 0x262   :  { %343 = vst [vmem:[#allocation2] sm:$0x3] %v342_v36 }
 0x263   :  { %456 = shalt.err (!%p453_p4)
}
 0x264   :  { %353 = dma.vmem_to_hbm [thread:$0]  %s351_s13, 32, %s601_s5, [#allocation3]  }
 0x265   :  { %465 = dma.done.wait [#allocation3], 32  }
 0x266   :  { %466 = vsyncadd [#allocation3], 4294967264 }
 0x267   :  { %357 = vsyncpa [#allocation3], 1 }

</bundles_post_ra>
